<compile_context>
chip_gen: v7x
topology: tpu7x:2x2x1
jax: 0.10.0
libtpu: 0.0.40
codegen_flags: <defaults>
</compile_context>

<pallas_src>
import math

import jax
import jax.numpy as jnp
from jax.experimental import pallas as pl
from jax.experimental.pallas import tpu as pltpu

LANE = 128        # lane-dense width for padded hidden features
W_ROWS = 128      # weight-row region inside each layer's slab slice
BIAS_ROW = 128    # bias lives on this sublane row
SLAB_ROWS = 136   # 128 weight rows + 1 bias row + 7 alignment rows (= 17 * 8)


def _make_mlp_kernel(in_size: int, out_size: int):
    """3-layer MLP (relu, relu, linear) on a lane-dense zero-padded param slab."""

    def mlp_kernel(x_ref, p_ref, o_ref):
        x = x_ref[...]                                        # [tb, in_size]

        # Layer 1: in_size -> 8 (zero-padded to 128 lanes) + ReLU.
        w1 = p_ref[0, :in_size, :]                            # [in_size, 128]
        b1 = p_ref[0, BIAS_ROW:BIAS_ROW + 1, :]               # [1, 128]
        h1 = jnp.maximum(
            jnp.dot(x, w1, preferred_element_type=jnp.float32) + b1, 0.0)

        # Layer 2: 8 -> 16 (padded rows/cols are zero, so full-lane matmul is exact).
        w2 = p_ref[1, :W_ROWS, :]                             # [128, 128]
        b2 = p_ref[1, BIAS_ROW:BIAS_ROW + 1, :]
        h2 = jnp.maximum(
            jnp.dot(h1, w2, preferred_element_type=jnp.float32) + b2, 0.0)

        # Layer 3: 16 -> out_size.  Weight columns narrowed to out_size so the HBM
        # writeback is (tb, out_size) instead of a 32x-padded (tb, 128) slab.
        w3 = p_ref[2, :W_ROWS, :out_size]                     # [128, out_size]
        b3 = p_ref[2, BIAS_ROW:BIAS_ROW + 1, :out_size]       # [1, out_size]
        o_ref[...] = (
            jnp.dot(h2, w3, preferred_element_type=jnp.float32) + b3
        ).astype(o_ref.dtype)

    return mlp_kernel


def pack_params(params):
    """Pack (w_i [in,out], b_i [1,out]) into one (3, 136, 128) f32 zero-padded slab."""
    slab = jnp.zeros((3, SLAB_ROWS, LANE), jnp.float32)
    for layer in range(3):
        w = params[f"w{layer + 1}"]
        b = params[f"b{layer + 1}"].reshape(-1)
        fan_in, fan_out = w.shape
        assert fan_in <= W_ROWS, f"fan_in={fan_in} > {W_ROWS} would clip / hit bias row"
        assert fan_out <= LANE, f"fan_out={fan_out} > {LANE} would clip"
        assert b.shape[0] == fan_out
        slab = slab.at[layer, :fan_in, :fan_out].set(w)
        slab = slab.at[layer, BIAS_ROW, :fan_out].set(b)
    return slab


def _choose_batch_tile(B: int, *, min_tb: int = 1024, max_tb: int = 4096) -> int:
    """1K-4K row tiles; large B gets >=2 grid steps (v7x megacore); tiny B -> one block."""
    if B <= min_tb:
        return B                          # single block == full array dim (no (8,128) issue)
    half = -(-B // 2)                     # cdiv(B, 2) so the grid has >= 2 steps
    tb = ((half + 7) // 8) * 8            # sublane-aligned
    return max(min_tb, min(max_tb, tb))


def simple_multi_output_forward(x, slab, out_size):
    """x: [B, in_size] f32; slab: packed params from pack_params; -> [B, out_size] f32."""
    B, in_size = x.shape
    tb = _choose_batch_tile(B)
    n_blocks = pl.cdiv(B, tb)

    cost = pl.CostEstimate(
        flops=2 * B * (in_size * LANE + LANE * LANE + LANE * out_size),
        transcendentals=0,
        bytes_accessed=(B * in_size + slab.size + B * out_size) * 4,
    )

    # Note: the slab's constant index_map means it is fetched once and stays resident;
    # its second pipeline buffer costs only ~0.2 MB of VMEM, so we leave the default
    # buffering rather than forcing single-buffering.
    return pl.pallas_call(
        _make_mlp_kernel(in_size, out_size),
        out_shape=jax.ShapeDtypeStruct((B, out_size), jnp.float32),
        grid=(n_blocks,),
        in_specs=[
            pl.BlockSpec((tb, in_size), lambda i: (i, 0)),             # batch tiles
            pl.BlockSpec((3, SLAB_ROWS, LANE), lambda i: (0, 0, 0)),   # VMEM-resident params
        ],
        out_specs=pl.BlockSpec((tb, out_size), lambda i: (i, 0)),
        compiler_params=pltpu.CompilerParams(
            dimension_semantics=("parallel",)),
        cost_estimate=cost,
    )(x, slab)


def init_params(key, input_size, output_size):
    """nn.Linear-style U(-1/sqrt(fan_in), 1/sqrt(fan_in)) init; W stored as [in, out]."""
    dims = [(input_size, 8), (8, 16), (16, output_size)]
    params = {}
    for i, (fan_in, fan_out) in enumerate(dims, start=1):
        key, kw, kb = jax.random.split(key, 3)
        bound = 1.0 / math.sqrt(fan_in)
        params[f"w{i}"] = jax.random.uniform(
            kw, (fan_in, fan_out), jnp.float32, -bound, bound)
        params[f"b{i}"] = jax.random.uniform(
            kb, (1, fan_out), jnp.float32, -bound, bound)
    return params


def reference_forward(x, params):
    h = jnp.maximum(x @ params["w1"] + params["b1"], 0.0)
    h = jnp.maximum(h @ params["w2"] + params["b2"], 0.0)
    return h @ params["w3"] + params["b3"]


if __name__ == "__main__":
    INPUT_SIZE = 32
    OUTPUT_SIZE = 4
    BATCH = 2

    key = jax.random.PRNGKey(0)
    key, kx = jax.random.split(key)
    x = jax.random.normal(kx, (BATCH, INPUT_SIZE), dtype=jnp.float32)
    params = init_params(key, INPUT_SIZE, OUTPUT_SIZE)
    slab = pack_params(params)

    # Small-batch path: single grid step, block == full batch.
    out = jax.block_until_ready(
        simple_multi_output_forward(x, slab, OUTPUT_SIZE))
    ref = reference_forward(x, params)
    assert out.shape == (BATCH, OUTPUT_SIZE)
    assert jnp.allclose(out, ref, atol=1e-5, rtol=1e-5)

    # Tiled path: multi-step parallel grid with a ragged edge block (no host pad/slice).
    key, kx2 = jax.random.split(key)
    x_big = jax.random.normal(kx2, (2500, INPUT_SIZE), dtype=jnp.float32)
    out_big = jax.block_until_ready(
        simple_multi_output_forward(x_big, slab, OUTPUT_SIZE))
    ref_big = reference_forward(x_big, params)
    assert out_big.shape == (2500, OUTPUT_SIZE)
    assert jnp.allclose(out_big, ref_big, atol=1e-4, rtol=1e-4)

    print("KERNEL_OK")
</pallas_src>

<mosaic_0001>
module attributes {stable_mosaic.version = 11 : i64} {
  func.func @mlp_kernel(%arg0: i32, %arg1: memref<2x32xf32, #tpu.memory_space<vmem>>, %arg2: memref<3x136x128xf32, #tpu.memory_space<vmem>>, %arg3: memref<2x4xf32, #tpu.memory_space<vmem>>) attributes {dimension_semantics = [#tpu.dimension_semantics<parallel>], iteration_bounds = array<i64: 1>, scalar_prefetch = 0 : i64, scratch_operands = 0 : i64, tpu.core_type = #tpu.core_type<tc>, window_params = [{transform_indices = @transform_0, window_bounds = array<i64: 2, 32>}, {pipeline_mode = #tpu.pipeline_mode<synchronous>, transform_indices = @transform_1, window_bounds = array<i64: 3, 136, 128>}, {transform_indices = @transform_2, window_bounds = array<i64: 2, 4>}]} {
    %c0 = arith.constant 0 : index
    %c0_0 = arith.constant 0 : index
    %0 = vector.load %arg1[%c0, %c0_0] : memref<2x32xf32, #tpu.memory_space<vmem>>, vector<2x32xf32>
    %c0_1 = arith.constant 0 : index
    %c0_2 = arith.constant 0 : index
    %c0_3 = arith.constant 0 : index
    %1 = vector.load %arg2[%c0_1, %c0_2, %c0_3] : memref<3x136x128xf32, #tpu.memory_space<vmem>>, vector<1x32x128xf32>
    %2 = vector.shape_cast %1 : vector<1x32x128xf32> to vector<32x128xf32>
    %c0_4 = arith.constant 0 : index
    %c128 = arith.constant 128 : index
    %c0_5 = arith.constant 0 : index
    %3 = vector.load %arg2[%c0_4, %c128, %c0_5] : memref<3x136x128xf32, #tpu.memory_space<vmem>>, vector<1x1x128xf32>
    %4 = vector.shape_cast %3 : vector<1x1x128xf32> to vector<1x128xf32>
    %cst = arith.constant dense<0.000000e+00> : vector<2x128xf32>
    %5 = tpu.matmul %0, %2, %cst {dimension_numbers = #tpu.dot_dimension_numbers<[1], [0], [0], [1], [0, 0, 1, 1], [], []>} : vector<2x32xf32>, vector<32x128xf32>, vector<2x128xf32> -> vector<2x128xf32>
    %6 = vector.broadcast %4 : vector<1x128xf32> to vector<2x128xf32>
    %7 = arith.addf %5, %6 : vector<2x128xf32>
    %cst_6 = arith.constant 0.000000e+00 : f32
    %8 = vector.broadcast %cst_6 : f32 to vector<2x128xf32>
    %9 = arith.maximumf %7, %8 : vector<2x128xf32>
    %c1 = arith.constant 1 : index
    %c0_7 = arith.constant 0 : index
    %c0_8 = arith.constant 0 : index
    %10 = vector.load %arg2[%c1, %c0_7, %c0_8] : memref<3x136x128xf32, #tpu.memory_space<vmem>>, vector<1x128x128xf32>
    %11 = vector.shape_cast %10 : vector<1x128x128xf32> to vector<128x128xf32>
    %c1_9 = arith.constant 1 : index
    %c128_10 = arith.constant 128 : index
    %c0_11 = arith.constant 0 : index
    %12 = vector.load %arg2[%c1_9, %c128_10, %c0_11] : memref<3x136x128xf32, #tpu.memory_space<vmem>>, vector<1x1x128xf32>
    %13 = vector.shape_cast %12 : vector<1x1x128xf32> to vector<1x128xf32>
    %cst_12 = arith.constant dense<0.000000e+00> : vector<2x128xf32>
    %14 = tpu.matmul %9, %11, %cst_12 {dimension_numbers = #tpu.dot_dimension_numbers<[1], [0], [0], [1], [0, 0, 1, 1], [], []>} : vector<2x128xf32>, vector<128x128xf32>, vector<2x128xf32> -> vector<2x128xf32>
    %15 = vector.broadcast %13 : vector<1x128xf32> to vector<2x128xf32>
    %16 = arith.addf %14, %15 : vector<2x128xf32>
    %cst_13 = arith.constant 0.000000e+00 : f32
    %17 = vector.broadcast %cst_13 : f32 to vector<2x128xf32>
    %18 = arith.maximumf %16, %17 : vector<2x128xf32>
    %c2 = arith.constant 2 : index
    %c0_14 = arith.constant 0 : index
    %c0_15 = arith.constant 0 : index
    %19 = vector.load %arg2[%c2, %c0_14, %c0_15] : memref<3x136x128xf32, #tpu.memory_space<vmem>>, vector<1x128x4xf32>
    %20 = vector.shape_cast %19 : vector<1x128x4xf32> to vector<128x4xf32>
    %c2_16 = arith.constant 2 : index
    %c128_17 = arith.constant 128 : index
    %c0_18 = arith.constant 0 : index
    %21 = vector.load %arg2[%c2_16, %c128_17, %c0_18] : memref<3x136x128xf32, #tpu.memory_space<vmem>>, vector<1x1x4xf32>
    %22 = vector.shape_cast %21 : vector<1x1x4xf32> to vector<1x4xf32>
    %cst_19 = arith.constant dense<0.000000e+00> : vector<2x4xf32>
    %23 = tpu.matmul %18, %20, %cst_19 {dimension_numbers = #tpu.dot_dimension_numbers<[1], [0], [0], [1], [0, 0, 1, 1], [], []>} : vector<2x128xf32>, vector<128x4xf32>, vector<2x4xf32> -> vector<2x4xf32>
    %24 = vector.broadcast %22 : vector<1x4xf32> to vector<2x4xf32>
    %25 = arith.addf %23, %24 : vector<2x4xf32>
    %c0_20 = arith.constant 0 : index
    %c0_21 = arith.constant 0 : index
    %26 = vector.load %arg3[%c0_20, %c0_21] : memref<2x4xf32, #tpu.memory_space<vmem>>, vector<2x4xf32>
    tpu.vector_store %arg3[%c0_20, %c0_21], %25 {strides = array<i32>} : memref<2x4xf32, #tpu.memory_space<vmem>>, vector<2x4xf32>,
    return
  }
  func.func @transform_0(%arg0: i32) -> (i32, i32) {
    %c0_i32 = arith.constant 0 : i32
    %c0_i32_0 = arith.constant 0 : i32
    return %arg0, %c0_i32 : i32, i32
  }
  func.func @transform_1(%arg0: i32) -> (i32, i32, i32) {
    %c0_i32 = arith.constant 0 : i32
    %c0_i32_0 = arith.constant 0 : i32
    %c0_i32_1 = arith.constant 0 : i32
    %c0_i32_2 = arith.constant 0 : i32
    return %c0_i32, %c0_i32_0, %c0_i32_1 : i32, i32, i32
  }
  func.func @transform_2(%arg0: i32) -> (i32, i32) {
    %c0_i32 = arith.constant 0 : i32
    %c0_i32_0 = arith.constant 0 : i32
    return %arg0, %c0_i32 : i32, i32
  }
}

</mosaic_0001>

<bundles_post_ra>
// kernel: tpu_custom_call.1
= control target key start
LH: loop header
LB: loop body
LE: loop exit
PB: predicated region body
PF: predicated region fallthrough
CT: control target
= control target key end

     0   :  { %7 = vsyncpa [#allocation3], 0  ;;  %s671_s0 = inlined_call_operand.hbm [shape: f32[2,32], index: 0, kind: input, shape index: {}]   ;;  %s672_s1 = inlined_call_operand.hbm [shape: f32[3,136,128], index: 1, kind: input, shape index: {}]   ;;  %s673_s2 = inlined_call_operand.hbm [shape: f32[2,4], index: 2, kind: output, shape index: {}]  }
   0x1   :  { %8 = vsyncpa [#allocation6], 0 }
   0x2   :  { %9 = vsyncpa [#allocation4], 0  ;;  %s584_s9 = smov [#allocation2]   ;;  %s585_s11 = smov [#allocation5]  }
   0x3   :  { %s16_s10 = sshll.u32 %s584_s9, 4  ;;  %s25_s12 = sshll.u32 %s585_s11, 4  ;;  %s17_s10 = int_to_ptr.vmem [resolvable:$true] %s16_s10  ;;  %s607_s12 = int_to_ptr.vmem [resolvable:$true] %s25_s12 }
   0x4   :  { %s512_s15 = scalar_lea.hbm %s671_s0, 32 }
   0x5   :  { %p513_p0 = scmp.ne.s32.totalorder %s671_s0, %s512_s15  ;;  %p516_p1 = scmp.lt.u32.totalorder %s512_s15, %s671_s0 }
   0x7   :  { %p518_p2 = pnand %p516_p1, %p513_p0 }
   0x9   :  { %521 = shalt.err (!%p518_p2)
}
   0xa   :  { %s522_s20 = scalar_lea.vmem %s17_s10, 32  ;;  %p527_p4 = scmp.lt.s32.totalorder %s17_s10, %s17_s10 }
   0xb   :  { %p523_p3 = scmp.ne.s32.totalorder %s17_s10, %s522_s20  ;;  %p528_p5 = scmp.lt.s32.totalorder %s522_s20, %s522_s20 }
   0xd   :  { %p529_p6 = por %p528_p5, %p527_p4 }
   0xf   :  { %p530_p7 = pnand %p529_p6, %p523_p3 }
  0x11   :  { %533 = shalt.err (!%p530_p7)
}
  0x12   :  { %19 = dma.hbm_to_vmem [thread:$0]  %s671_s0, 32, %s17_s10, [#allocation3]  }
  0x13   :  { %s534_s25 = scalar_lea.hbm %s672_s1, 6528 }
  0x14   :  { %p535_p8 = scmp.ne.s32.totalorder %s672_s1, %s534_s25  ;;  %p538_p9 = scmp.lt.u32.totalorder %s534_s25, %s672_s1 }
  0x16   :  { %p540_p10 = pnand %p538_p9, %p535_p8 }
  0x18   :  { %543 = shalt.err (!%p540_p10)
}
  0x19   :  { %s544_s30 = scalar_lea.vmem %s607_s12, 6528  ;;  %p549_p12 = scmp.lt.s32.totalorder %s607_s12, %s607_s12 }
  0x1a   :  { %p545_p11 = scmp.ne.s32.totalorder %s607_s12, %s544_s30  ;;  %p550_p13 = scmp.lt.s32.totalorder %s544_s30, %s544_s30 }
  0x1c   :  { %p551_p0 = por %p550_p13, %p549_p12 }
  0x1e   :  { %p552_p1 = pnand %p551_p0, %p545_p11 }
  0x20   :  { %555 = shalt.err (!%p552_p1)
}
  0x21   :  { %s586_s0 = smov 128   ;;  %s587_s3 = smov 8  }
  0x22   :  { %31 = dma.hbm_to_vmem [thread:$0]  %s672_s1, 6528, %s607_s12, [#allocation6], %s586_s0, %s586_s0, %s587_s3  }
  0x23   :  { %578 = dma.done.wait [#allocation3], 32  }
  0x24   :  { %579 = vsyncadd [#allocation3], 4294967264 }
  0x25   :  { %580 = dma.done.wait [#allocation6], 6528  }
  0x26   :  { %581 = vsyncadd [#allocation6], 4294960768  ;;  %v588_v0 = vmov 0.0|0.0   ;;  %vm589_vm0 = vmmov 0   ;;  %v590_v1 = vmov 0.0   ;;  %v39_v2 = vld [vmem:[#allocation5] sm:$0xff] }
  0x27   :  { %450 = vmatprep.subr.bf16.mxu0 %v588_v0  ;;  %377 = vmatprep.mubr.msk.f32.mxu0 %vm589_vm0, %v590_v1  ;;  %v40_v3 = vld [vmem:[#allocation5 + $0x8] sm:$0xff]  ;;  %v41_v4 = vld [vmem:[#allocation5 + $0x10] sm:$0xff]  ;;  %v42_v6 = vld [vmem:[#allocation5 + $0x18] sm:$0xff]  ;;  %vm48_vm1 = vcmask 261120   ;;  %s591_s1 = smov [#allocation7]   ;;  %vm308_vm2 = vcmask 25600  }
  0x28   :  { %456 = vmatprep.subr.bf16.mxu1 %v588_v0  ;;  %412 = vmatprep.mubr.msk.f32.mxu1 %vm589_vm0, %v590_v1  ;;  %v451_v5 = vpack.c.bf16 %v40_v3, %v39_v2  ;;  %v124_v7 = vld [vmem:[#allocation5 + $0x88] sm:$0xff]  ;;  %v125_v8 = vld [vmem:[#allocation5 + $0x90] sm:$0xff]  ;;  %v126_v9 = vld [vmem:[#allocation5 + $0x98] sm:$0xff]  ;;  %v454_v11 = vpack.c.bf16 %v42_v6, %v41_v4  ;;  %s316_s6 = sshll.u32 %s591_s1, 4  ;;  %s317_s6 = int_to_ptr.vmem [resolvable:$true] %s316_s6 }
  0x29   :  { %v127_v10 = vld [vmem:[#allocation5 + $0xa0] sm:$0xff]  ;;  %v457_v12 = vpack.c.bf16 %v125_v8, %v124_v7  ;;  %v128_v14 = vld [vmem:[#allocation5 + $0xa8] sm:$0xff]  ;;  %v129_v15 = vld [vmem:[#allocation5 + $0xb0] sm:$0xff]  ;;  %s556_s7 = scalar_lea.vmem %s317_s6, 32  ;;  %p561_p3 = scmp.lt.s32.totalorder %s317_s6, %s317_s6 }
  0x2a   :  { %452 = vmatpush3.bf16.msra.mxu0 %v451_v5  ;;  %v460_v13 = vpack.c.bf16 %v127_v10, %v126_v9  ;;  %v38_v16 = vld [vmem:[#allocation2] sm:$0x3]  ;;  %v463_v17 = vpack.c.bf16 %v129_v15, %v128_v14  ;;  %v131_v19 = vld [vmem:[#allocation5 + $0xc0] sm:$0xff]  ;;  %v132_v21 = vld [vmem:[#allocation5 + $0xc8] sm:$0xff]  ;;  %p557_p2 = scmp.ne.s32.totalorder %s317_s6, %s556_s7  ;;  %p562_p4 = scmp.lt.s32.totalorder %s556_s7, %s556_s7 }
  0x2b   :  { %453 = vmatprep.subr.bf16.mxu0 %v588_v0  ;;  %458 = vmatpush3.bf16.msra.mxu1 %v457_v12  ;;  %v130_v18 = vld [vmem:[#allocation5 + $0xb8] sm:$0xff]  ;;  %v133_v22 = vld [vmem:[#allocation5 + $0xd0] sm:$0xff]  ;;  %v135_v25 = vld [vmem:[#allocation5 + $0xe0] sm:$0xff] }
  0x2c   :  { %459 = vmatprep.subr.bf16.mxu1 %v588_v0  ;;  %v466_v20 = vpack.c.bf16 %v131_v19, %v130_v18  ;;  %v469_v23 = vpack.c.bf16 %v133_v22, %v132_v21  ;;  %v134_v24 = vld [vmem:[#allocation5 + $0xd8] sm:$0xff]  ;;  %v136_v27 = vld [vmem:[#allocation5 + $0xe8] sm:$0xff]  ;;  %v137_v28 = vld [vmem:[#allocation5 + $0xf0] sm:$0xff]  ;;  %p563_p5 = por %p562_p4, %p561_p3 }
  0x2d   :  { %v472_v26 = vpack.c.bf16 %v135_v25, %v134_v24  ;;  %v475_v29 = vpack.c.bf16 %v137_v28, %v136_v27  ;;  %v138_v30 = vld [vmem:[#allocation5 + $0xf8] sm:$0xff]  ;;  %v139_v31 = vld [vmem:[#allocation5 + $0x100] sm:$0xff]  ;;  %v217_v33 = vld [vmem:[#allocation5 + $0x110] sm:$0xff] }
  0x2e   :  { %455 = vmatpush3.bf16.msra.mxu0 %v454_v11  ;;  %v478_v32 = vpack.c.bf16 %v139_v31, %v138_v30  ;;  %v218_v34 = vld [vmem:[#allocation5 + $0x118] sm:$0xff]  ;;  %v219_v35 = vld [vmem:[#allocation5 + $0x120] sm:$0xff]  ;;  %v220_v37 = vld [vmem:[#allocation5 + $0x128] sm:$0xff]  ;;  %p564_p6 = pnand %p563_p5, %p557_p2 }
  0x2f   :  { %480 = vmatprep.subr.bf16.mxu0 %v588_v0  ;;  %461 = vmatpush3.bf16.msra.mxu1 %v460_v13  ;;  %v481_v36 = vpack.c.bf16 %v218_v34, %v217_v33  ;;  %v484_v38 = vpack.c.bf16 %v220_v37, %v219_v35  ;;  %v221_v39 = vld [vmem:[#allocation5 + $0x130] sm:$0xff]  ;;  %v222_v40 = vld [vmem:[#allocation5 + $0x138] sm:$0xff]  ;;  %v223_v42 = vld [vmem:[#allocation5 + $0x140] sm:$0xff] }
  0x30   :  { %462 = vmatprep.subr.bf16.mxu1 %v588_v0  ;;  %v487_v41 = vpack.c.bf16 %v222_v40, %v221_v39  ;;  %v224_v43 = vld [vmem:[#allocation5 + $0x148] sm:$0xff]  ;;  %v225_v45 = vld [vmem:[#allocation5 + $0x150] sm:$0xff]  ;;  %v226_v46 = vld [vmem:[#allocation5 + $0x158] sm:$0xff] }
  0x31   :  { %378 = vmatmul.mubr.msk.f32.vlgmr.msra.gmra.mrb[0].mxu0 %vm48_vm1, %v38_v16  ;;  %v490_v44 = vpack.c.bf16 %v224_v43, %v223_v42  ;;  %v493_v47 = vpack.c.bf16 %v226_v46, %v225_v45  ;;  %v227_v48 = vld [vmem:[#allocation5 + $0x160] sm:$0xff]  ;;  %v228_v49 = vld [vmem:[#allocation5 + $0x168] sm:$0xff]  ;;  %v229_v51 = vld [vmem:[#allocation5 + $0x170] sm:$0xff] }
  0x32   :  { %447 = vmatprep.mubr.msk.f32.mxu0 %vm589_vm0, %v590_v1  ;;  %482 = vmatpush3.bf16.msra.mxu0 %v481_v36  ;;  %v496_v50 = vpack.c.bf16 %v228_v49, %v227_v48  ;;  %v230_v52 = vld [vmem:[#allocation5 + $0x178] sm:$0xff]  ;;  %v326_v54 = vld [vmem:[#allocation5 + $0x80] ss:$0 sm:$0xff]  ;;  %v232_v60 = vld [vmem:[#allocation5 + $0x188] sm:$0xff] }
  0x33   :  { %464 = vmatpush3.bf16.msra.mxu1 %v463_v17  ;;  %483 = vmatprep.subr.bf16.mxu0 %v588_v0  ;;  %v499_v53 = vpack.c.bf16 %v230_v52, %v229_v51  ;;  %v231_v59 = vld [vmem:[#allocation5 + $0x180] sm:$0xff]  ;;  %v328_v62 = vld [vmem:[#allocation5 + $0x108] ss:$0 sm:$0xff]  ;;  %v329_v4 = vld [vmem:[#allocation5 + $0x190] ss:$0 sm:$0xff] }
  0x34   :  { %465 = vmatprep.subr.bf16.mxu1 %v588_v0  ;;  %v502_v61 = vpack.c.bf16 %v232_v60, %v231_v59 }
  0x36   :  { %485 = vmatpush3.bf16.msra.mxu0 %v484_v38 }
  0x37   :  { %467 = vmatpush3.bf16.msra.mxu1 %v466_v20  ;;  %486 = vmatprep.subr.bf16.mxu0 %v588_v0 }
  0x38   :  { %468 = vmatprep.subr.bf16.mxu1 %v588_v0 }
  0x3a   :  { %488 = vmatpush3.bf16.msra.mxu0 %v487_v41 }
  0x3b   :  { %470 = vmatpush3.bf16.msra.mxu1 %v469_v23  ;;  %489 = vmatprep.subr.bf16.mxu0 %v588_v0 }
  0x3c   :  { %471 = vmatprep.subr.bf16.mxu1 %v588_v0 }
  0x3e   :  { %491 = vmatpush3.bf16.msra.mxu0 %v490_v44 }
  0x3f   :  { %473 = vmatpush3.bf16.msra.mxu1 %v472_v26  ;;  %492 = vmatprep.subr.bf16.mxu0 %v588_v0 }
  0x40   :  { %474 = vmatprep.subr.bf16.mxu1 %v588_v0 }
  0x42   :  { %494 = vmatpush3.bf16.msra.mxu0 %v493_v47 }
  0x43   :  { %476 = vmatpush3.bf16.msra.mxu1 %v475_v29  ;;  %495 = vmatprep.subr.bf16.mxu0 %v588_v0 }
  0x44   :  { %477 = vmatprep.subr.bf16.mxu1 %v588_v0 }
  0x46   :  { %497 = vmatpush3.bf16.msra.mxu0 %v496_v50 }
  0x47   :  { %479 = vmatpush3.bf16.msra.mxu1 %v478_v32  ;;  %498 = vmatprep.subr.bf16.mxu0 %v588_v0 }
  0x4a   :  { %500 = vmatpush3.bf16.msra.mxu0 %v499_v53 }
  0x4b   :  { %501 = vmatprep.subr.bf16.mxu0 %v588_v0 }
  0x4e   :  { %503 = vmatpush3.bf16.msra.mxu0 %v502_v61 }
 0x104   :  { %v118_v55 = vpop.f32.mrb[0].mxu0 }
 0x105   :  { %v119_v56 = vadd.f32 %v326_v54, %v118_v55  ;;  %v379_v57 = vpop.f32.mrb[1].mxu0 }
 0x107   :  { %v122_v58 = vmax.f32 %v119_v56, 0.0 }
 0x109   :  { %413 = vmatmul.mubr.f32.vlgmr.msra.gmra.mrb[0].mxu1 %v122_v58 }
 0x1dc   :  { %v211_v63 = vpop.f32.mrb[0].mxu1 }
 0x1dd   :  { %v212_v1 = vadd.f32 %v328_v62, %v211_v63  ;;  %v414_v2 = vpop.f32.mrb[1].mxu1 }
 0x1df   :  { %v215_v3 = vmax.f32 %v212_v1, 0.0 }
 0x1e1   :  { %448 = vmatmul.mubr.f32.vlgmr.msra.gmra.mrb[2].mxu0 %v215_v3 }
 0x2b4   :  { %v304_v0 = vpop.f32.mrb[2].mxu0 }
 0x2b5   :  { %v305_v5 = vadd.f32 %v329_v4, %v304_v0  ;;  %v449_v6 = vpop.f32.mrb[3].mxu0 }
 0x2b7   :  { %309 = vst.msk [vmem:[#allocation7] sm:$0x3] %vm308_vm2, %v305_v5 }
 0x2b8   :  { %567 = shalt.err (!%p564_p6)
}
 0x2b9   :  { %s568_s10 = scalar_lea.hbm %s673_s2, 32 }
 0x2ba   :  { %p569_p7 = scmp.ne.s32.totalorder %s673_s2, %s568_s10  ;;  %p572_p8 = scmp.lt.u32.totalorder %s568_s10, %s673_s2 }
 0x2bc   :  { %p574_p9 = pnand %p572_p8, %p569_p7 }
 0x2be   :  { %577 = shalt.err (!%p574_p9)
}
 0x2bf   :  { %319 = dma.vmem_to_hbm [thread:$0]  %s317_s6, 32, %s673_s2, [#allocation4]  }
 0x2c0   :  { %582 = dma.done.wait [#allocation4], 32  }
 0x2c1   :  { %583 = vsyncadd [#allocation4], 4294967264 }
 0x2c2   :  { %323 = vsyncpa [#allocation3], 1 }
 0x2c3   :  { %324 = vsyncpa [#allocation6], 1 }
 0x2c4   :  { %325 = vsyncpa [#allocation4], 1 }

</bundles_post_ra>
